<compile_context>
chip_gen: v5e
topology: v5e:2x2
jax: 0.10.0
libtpu: 0.0.40
codegen_flags: <defaults>
</compile_context>

<pallas_src>
import functools

import jax
import jax.numpy as jnp
from jax import lax
from jax.experimental import pallas as pl
from jax.experimental.pallas import tpu as pltpu

EPS = 1e-5  # nn.BatchNorm1d default eps


def _resblock1d_kernel(x_ref, w1_ref, g1_ref, b1_ref, w2_ref, g2_ref, b2_ref,
                       o_ref, xw_ref, *, kernel_size):
    N, C, L = x_ref.shape
    NL = N * L
    inv_nl = 1.0 / float(NL)
    pad_l = (kernel_size - 1) // 2          # PyTorch 'same': left = (K-1)//2

    # Stage (N, C, L) -> (C, N*L) working slab: one lane-aligned (C, L) store
    # per batch element.  This is the only staging copy in the kernel.
    for n in range(N):                      # N is static & small -> unrolled
        xw_ref[:, n * L:(n + 1) * L] = x_ref[n].astype(jnp.float32)

    # Per-tap boundary masks, built once and shared by both convs.
    # l_within[c, n*L + l] == l ; tap offset d is valid iff 0 <= l + d < L.
    base_iota = lax.broadcasted_iota(jnp.int32, (C, L), 1)
    l_within = jnp.concatenate([base_iota] * N, axis=1)        # (C, N*L)
    tap_masks = []
    for k in range(kernel_size):
        d = k - pad_l
        if d == 0:
            tap_masks.append(None)
        elif d > 0:
            tap_masks.append(l_within < (L - d))
        else:
            tap_masks.append(l_within >= (-d))

    def conv(h, w_ref):
        # 'same' 1-D cross-correlation: K accumulated (Cout, Cin) @ (Cin, N*L)
        # MXU matmuls on rolled + masked views of the live activation.  (For
        # large C a single (Cout, K*Cin) @ (K*Cin, N*L) matmul would feed the
        # MXU better; at DeepAb-scale channel counts the accumulate form avoids
        # the im2col staging copy entirely.)
        acc = None
        for k in range(kernel_size):
            d = k - pad_l
            if d == 0:
                tap = h
            else:
                tap = pltpu.roll(h, shift=(-d) % NL, axis=1)   # XLU rotation
                tap = jnp.where(tap_masks[k], tap, 0.0)        # zero padding
            term = jnp.dot(w_ref[k], tap.astype(w_ref.dtype),
                           preferred_element_type=jnp.float32)
            acc = term if acc is None else acc + term
        return acc

    def bn_fold(y, gamma, beta):
        # Training-mode BatchNorm1d folded into a per-channel scale/shift,
        # two-pass (mean, then centered variance) f32 reduction over lanes.
        mean = jnp.sum(y, axis=1, keepdims=True) * inv_nl            # (C, 1)
        cent = y - mean
        var = jnp.sum(cent * cent, axis=1, keepdims=True) * inv_nl   # biased
        scale = gamma * lax.rsqrt(var + EPS)
        shift = beta - mean * scale
        return scale, shift

    # Conv1 -> BN1 (folded per-channel FMA) -> ReLU.
    h = conv(xw_ref[...], w1_ref)
    s, t = bn_fold(h, g1_ref[...], b1_ref[...])
    h = jnp.maximum(h * s + t, 0.0)

    # Conv2 -> BN2; conv2 consumes the live h (no VMEM re-staging round-trip).
    h = conv(h, w2_ref)
    s, t = bn_fold(h, g2_ref[...], b2_ref[...])

    # Residual add (x re-read from the slab, not kept live across the convs)
    # + final ReLU; per-batch output stores are lane-dense in L.
    res = jnp.maximum(xw_ref[...] + (h * s + t), 0.0)
    for n in range(N):
        o_ref[n, :, :] = res[:, n * L:(n + 1) * L].astype(o_ref.dtype)


@functools.partial(jax.jit, static_argnames=("use_bf16_matmul",))
def resblock1d_forward(x_ncl, w1, g1, b1, w2, g2, b2, *, use_bf16_matmul=False):
    """ResBlock1D forward.  x_ncl: (N, C, L); w*: (Cout, Cin, K), bias-free."""
    N, C, L = x_ncl.shape
    Cout, Cin, K = w1.shape
    mm_dtype = jnp.bfloat16 if use_bf16_matmul else jnp.float32

    # Conv1d weights (Cout, Cin, K) -> (K, Cout, Cin): one (Cout, Cin) slab per
    # tap (tiny one-off relayout in the wrapper).
    w1_k = jnp.transpose(w1, (2, 0, 1)).astype(mm_dtype)
    w2_k = jnp.transpose(w2, (2, 0, 1)).astype(mm_dtype)
    g1r = g1.reshape(C, 1).astype(jnp.float32)
    b1r = b1.reshape(C, 1).astype(jnp.float32)
    g2r = g2.reshape(C, 1).astype(jnp.float32)
    b2r = b2.reshape(C, 1).astype(jnp.float32)

    # VMEM budget: x + staging slab + live conv/tap/output values (~8
    # activation-sized f32 arrays) + weights + headroom, capped at 75% of the
    # physical per-core VMEM (64 MiB on v7x, 128 MiB on v5e/v6e).
    act_bytes = N * C * L * 4
    want = 8 * act_bytes + 2 * (K * Cout * Cin * 4) + (2 << 20)
    try:
        cap = int(0.75 * pltpu.get_tpu_info().vmem_capacity_bytes)
    except Exception:  # conservative fallback valid on v5e/v6e/v7x
        cap = 48 * 1024 * 1024
    vmem_limit = int(min(cap, max(4 << 20, want)))

    vmem = pl.BlockSpec(memory_space=pltpu.MemorySpace.VMEM)
    return pl.pallas_call(
        functools.partial(_resblock1d_kernel, kernel_size=K),
        out_shape=jax.ShapeDtypeStruct((N, C, L), x_ncl.dtype),
        in_specs=[vmem] * 7,
        out_specs=vmem,
        scratch_shapes=[pltpu.VMEM((C, N * L), jnp.float32)],
        compiler_params=pltpu.CompilerParams(vmem_limit_bytes=vmem_limit),
    )(x_ncl, w1_k, g1r, b1r, w2_k, g2r, b2r)


def _reference_forward(x, w1, g1, b1, w2, g2, b2):
    """Pure-JAX reference mirroring the PyTorch module (training-mode BN)."""
    def conv(h, w):
        k = w.shape[-1]
        pad_l = (k - 1) // 2
        return lax.conv_general_dilated(
            h, w, window_strides=(1,), padding=[(pad_l, k - 1 - pad_l)],
            dimension_numbers=("NCH", "OIH", "NCH"),
            precision=lax.Precision.HIGHEST)

    def bn(y, g, b):
        mean = jnp.mean(y, axis=(0, 2), keepdims=True)
        var = jnp.mean(jnp.square(y - mean), axis=(0, 2), keepdims=True)
        return ((y - mean) * lax.rsqrt(var + EPS)) * g.reshape(1, -1, 1) \
            + b.reshape(1, -1, 1)

    h = jax.nn.relu(bn(conv(x, w1), g1, b1))
    h = bn(conv(h, w2), g2, b2)
    return jax.nn.relu(x + h)


if __name__ == "__main__":
    # Small shapes consistent with ResBlock1D(channel=8, kernel_size=3, stride=1).
    # L is a multiple of 128 so every large store in the kernel is lane-dense.
    N, C, L, K = 2, 8, 128, 3

    key = jax.random.PRNGKey(0)
    kx, kw1, kw2, kg1, kb1, kg2, kb2 = jax.random.split(key, 7)

    x = jax.random.normal(kx, (N, C, L), dtype=jnp.float32)
    # Conv1d weights: (Cout, Cin, K), bias=False.
    w1 = jax.random.normal(kw1, (C, C, K), dtype=jnp.float32) * 0.1
    w2 = jax.random.normal(kw2, (C, C, K), dtype=jnp.float32) * 0.1
    # BatchNorm1d affine params (perturbed from gamma=1, beta=0 so the affine
    # transform is actually exercised).
    g1 = 1.0 + 0.1 * jax.random.normal(kg1, (C,), dtype=jnp.float32)
    b1 = 0.1 * jax.random.normal(kb1, (C,), dtype=jnp.float32)
    g2 = 1.0 + 0.1 * jax.random.normal(kg2, (C,), dtype=jnp.float32)
    b2 = 0.1 * jax.random.normal(kb2, (C,), dtype=jnp.float32)

    out = resblock1d_forward(x, w1, g1, b1, w2, g2, b2)
    jax.block_until_ready(out)

    ref = _reference_forward(x, w1, g1, b1, w2, g2, b2)
    assert out.shape == (N, C, L)
    assert bool(jnp.all(jnp.isfinite(out)))
    assert bool(jnp.all(out >= 0.0))            # final ReLU
    max_err = float(jnp.max(jnp.abs(out - ref)))
    assert max_err < 1e-3, f"mismatch vs pure-JAX reference: {max_err}"
    print("KERNEL_OK")
</pallas_src>

<mosaic_0001>
module attributes {stable_mosaic.version = 11 : i64} {
  func.func @_resblock1d_kernel(%arg0: memref<2x8x128xf32, #tpu.memory_space<vmem>>, %arg1: memref<3x8x8xf32, #tpu.memory_space<vmem>>, %arg2: memref<8x1xf32, #tpu.memory_space<vmem>>, %arg3: memref<8x1xf32, #tpu.memory_space<vmem>>, %arg4: memref<3x8x8xf32, #tpu.memory_space<vmem>>, %arg5: memref<8x1xf32, #tpu.memory_space<vmem>>, %arg6: memref<8x1xf32, #tpu.memory_space<vmem>>, %arg7: memref<2x8x128xf32, #tpu.memory_space<vmem>>, %arg8: memref<8x256xf32, #tpu.memory_space<vmem>>) attributes {dimension_semantics = [], scalar_prefetch = 0 : i64, scratch_operands = 1 : i64, tpu.core_type = #tpu.core_type<tc>} {
    %c0 = arith.constant 0 : index
    %c0_0 = arith.constant 0 : index
    %c0_1 = arith.constant 0 : index
    %0 = vector.load %arg0[%c0, %c0_0, %c0_1] : memref<2x8x128xf32, #tpu.memory_space<vmem>>, vector<1x8x128xf32>
    %1 = vector.shape_cast %0 : vector<1x8x128xf32> to vector<8x128xf32>
    %c0_2 = arith.constant 0 : index
    %c0_3 = arith.constant 0 : index
    %2 = vector.load %arg8[%c0_2, %c0_3] : memref<8x256xf32, #tpu.memory_space<vmem>>, vector<8x128xf32>
    tpu.vector_store %arg8[%c0_2, %c0_3], %1 {strides = array<i32>} : memref<8x256xf32, #tpu.memory_space<vmem>>, vector<8x128xf32>,
    %c1 = arith.constant 1 : index
    %c0_4 = arith.constant 0 : index
    %c0_5 = arith.constant 0 : index
    %3 = vector.load %arg0[%c1, %c0_4, %c0_5] : memref<2x8x128xf32, #tpu.memory_space<vmem>>, vector<1x8x128xf32>
    %4 = vector.shape_cast %3 : vector<1x8x128xf32> to vector<8x128xf32>
    %c0_6 = arith.constant 0 : index
    %c128 = arith.constant 128 : index
    %5 = vector.load %arg8[%c0_6, %c128] : memref<8x256xf32, #tpu.memory_space<vmem>>, vector<8x128xf32>
    tpu.vector_store %arg8[%c0_6, %c128], %4 {strides = array<i32>} : memref<8x256xf32, #tpu.memory_space<vmem>>, vector<8x128xf32>,
    %6 = tpu.iota {dimensions = array<i32: 1>} : vector<8x128xi32>
    %7 = tpu.concatenate %6, %6 in 1 : vector<8x128xi32>, vector<8x128xi32> -> vector<8x256xi32>
    %c1_i32 = arith.constant 1 : i32
    %8 = vector.broadcast %c1_i32 : i32 to vector<8x256xi32>
    %9 = arith.cmpi sge, %7, %8 : vector<8x256xi32>
    %c127_i32 = arith.constant 127 : i32
    %10 = vector.broadcast %c127_i32 : i32 to vector<8x256xi32>
    %11 = arith.cmpi slt, %7, %10 : vector<8x256xi32>
    %c0_7 = arith.constant 0 : index
    %c0_8 = arith.constant 0 : index
    %12 = vector.load %arg8[%c0_7, %c0_8] : memref<8x256xf32, #tpu.memory_space<vmem>>, vector<8x256xf32>
    %c1_i32_9 = arith.constant 1 : i32
    %13 = tpu.dynamic_rotate %12 by %c1_i32_9 dim 1 : vector<8x256xf32>, i32 -> vector<8x256xf32>
    %cst = arith.constant 0.000000e+00 : f32
    %14 = vector.broadcast %cst : f32 to vector<8x256xf32>
    %15 = arith.select %9, %13, %14 : vector<8x256xi1>, vector<8x256xf32>
    %c0_10 = arith.constant 0 : index
    %c0_11 = arith.constant 0 : index
    %c0_12 = arith.constant 0 : index
    %16 = vector.load %arg1[%c0_10, %c0_11, %c0_12] : memref<3x8x8xf32, #tpu.memory_space<vmem>>, vector<1x8x8xf32>
    %17 = vector.shape_cast %16 : vector<1x8x8xf32> to vector<8x8xf32>
    %cst_13 = arith.constant dense<0.000000e+00> : vector<8x256xf32>
    %18 = tpu.matmul %17, %15, %cst_13 {dimension_numbers = #tpu.dot_dimension_numbers<[1], [0], [0], [1], [0, 0, 1, 1], [], []>} : vector<8x8xf32>, vector<8x256xf32>, vector<8x256xf32> -> vector<8x256xf32>
    %c1_14 = arith.constant 1 : index
    %c0_15 = arith.constant 0 : index
    %c0_16 = arith.constant 0 : index
    %19 = vector.load %arg1[%c1_14, %c0_15, %c0_16] : memref<3x8x8xf32, #tpu.memory_space<vmem>>, vector<1x8x8xf32>
    %20 = vector.shape_cast %19 : vector<1x8x8xf32> to vector<8x8xf32>
    %cst_17 = arith.constant dense<0.000000e+00> : vector<8x256xf32>
    %21 = tpu.matmul %20, %12, %cst_17 {dimension_numbers = #tpu.dot_dimension_numbers<[1], [0], [0], [1], [0, 0, 1, 1], [], []>} : vector<8x8xf32>, vector<8x256xf32>, vector<8x256xf32> -> vector<8x256xf32>
    %22 = arith.addf %18, %21 : vector<8x256xf32>
    %c255_i32 = arith.constant 255 : i32
    %23 = tpu.dynamic_rotate %12 by %c255_i32 dim 1 : vector<8x256xf32>, i32 -> vector<8x256xf32>
    %cst_18 = arith.constant 0.000000e+00 : f32
    %24 = vector.broadcast %cst_18 : f32 to vector<8x256xf32>
    %25 = arith.select %11, %23, %24 : vector<8x256xi1>, vector<8x256xf32>
    %c2 = arith.constant 2 : index
    %c0_19 = arith.constant 0 : index
    %c0_20 = arith.constant 0 : index
    %26 = vector.load %arg1[%c2, %c0_19, %c0_20] : memref<3x8x8xf32, #tpu.memory_space<vmem>>, vector<1x8x8xf32>
    %27 = vector.shape_cast %26 : vector<1x8x8xf32> to vector<8x8xf32>
    %cst_21 = arith.constant dense<0.000000e+00> : vector<8x256xf32>
    %28 = tpu.matmul %27, %25, %cst_21 {dimension_numbers = #tpu.dot_dimension_numbers<[1], [0], [0], [1], [0, 0, 1, 1], [], []>} : vector<8x8xf32>, vector<8x256xf32>, vector<8x256xf32> -> vector<8x256xf32>
    %29 = arith.addf %22, %28 : vector<8x256xf32>
    %c0_22 = arith.constant 0 : index
    %c0_23 = arith.constant 0 : index
    %30 = vector.load %arg2[%c0_22, %c0_23] : memref<8x1xf32, #tpu.memory_space<vmem>>, vector<8x1xf32>
    %c0_24 = arith.constant 0 : index
    %c0_25 = arith.constant 0 : index
    %31 = vector.load %arg3[%c0_24, %c0_25] : memref<8x1xf32, #tpu.memory_space<vmem>>, vector<8x1xf32>
    %cst_26 = arith.constant dense<0.000000e+00> : vector<8xf32>
    %32 = vector.multi_reduction <add>, %29, %cst_26 [1] : vector<8x256xf32> to vector<8xf32>
    %33 = vector.shape_cast %32 : vector<8xf32> to vector<8x1xf32>
    %cst_27 = arith.constant 3.906250e-03 : f32
    %34 = vector.broadcast %cst_27 : f32 to vector<8x1xf32>
    %35 = arith.mulf %33, %34 : vector<8x1xf32>
    %36 = vector.broadcast %35 : vector<8x1xf32> to vector<8x256xf32>
    %37 = arith.subf %29, %36 : vector<8x256xf32>
    %38 = arith.mulf %37, %37 : vector<8x256xf32>
    %cst_28 = arith.constant dense<0.000000e+00> : vector<8xf32>
    %39 = vector.multi_reduction <add>, %38, %cst_28 [1] : vector<8x256xf32> to vector<8xf32>
    %40 = vector.shape_cast %39 : vector<8xf32> to vector<8x1xf32>
    %cst_29 = arith.constant 3.906250e-03 : f32
    %41 = vector.broadcast %cst_29 : f32 to vector<8x1xf32>
    %42 = arith.mulf %40, %41 : vector<8x1xf32>
    %cst_30 = arith.constant 9.99999974E-6 : f32
    %43 = vector.broadcast %cst_30 : f32 to vector<8x1xf32>
    %44 = arith.addf %42, %43 : vector<8x1xf32>
    %45 = math.rsqrt %44 : vector<8x1xf32>
    %46 = arith.mulf %30, %45 : vector<8x1xf32>
    %47 = arith.mulf %35, %46 : vector<8x1xf32>
    %48 = arith.subf %31, %47 : vector<8x1xf32>
    %49 = vector.broadcast %46 : vector<8x1xf32> to vector<8x256xf32>
    %50 = arith.mulf %29, %49 : vector<8x256xf32>
    %51 = vector.broadcast %48 : vector<8x1xf32> to vector<8x256xf32>
    %52 = arith.addf %50, %51 : vector<8x256xf32>
    %cst_31 = arith.constant 0.000000e+00 : f32
    %53 = vector.broadcast %cst_31 : f32 to vector<8x256xf32>
    %54 = arith.maximumf %52, %53 : vector<8x256xf32>
    %c1_i32_32 = arith.constant 1 : i32
    %55 = tpu.dynamic_rotate %54 by %c1_i32_32 dim 1 : vector<8x256xf32>, i32 -> vector<8x256xf32>
    %cst_33 = arith.constant 0.000000e+00 : f32
    %56 = vector.broadcast %cst_33 : f32 to vector<8x256xf32>
    %57 = arith.select %9, %55, %56 : vector<8x256xi1>, vector<8x256xf32>
    %c0_34 = arith.constant 0 : index
    %c0_35 = arith.constant 0 : index
    %c0_36 = arith.constant 0 : index
    %58 = vector.load %arg4[%c0_34, %c0_35, %c0_36] : memref<3x8x8xf32, #tpu.memory_space<vmem>>, vector<1x8x8xf32>
    %59 = vector.shape_cast %58 : vector<1x8x8xf32> to vector<8x8xf32>
    %cst_37 = arith.constant dense<0.000000e+00> : vector<8x256xf32>
    %60 = tpu.matmul %59, %57, %cst_37 {dimension_numbers = #tpu.dot_dimension_numbers<[1], [0], [0], [1], [0, 0, 1, 1], [], []>} : vector<8x8xf32>, vector<8x256xf32>, vector<8x256xf32> -> vector<8x256xf32>
    %c1_38 = arith.constant 1 : index
    %c0_39 = arith.constant 0 : index
    %c0_40 = arith.constant 0 : index
    %61 = vector.load %arg4[%c1_38, %c0_39, %c0_40] : memref<3x8x8xf32, #tpu.memory_space<vmem>>, vector<1x8x8xf32>
    %62 = vector.shape_cast %61 : vector<1x8x8xf32> to vector<8x8xf32>
    %cst_41 = arith.constant dense<0.000000e+00> : vector<8x256xf32>
    %63 = tpu.matmul %62, %54, %cst_41 {dimension_numbers = #tpu.dot_dimension_numbers<[1], [0], [0], [1], [0, 0, 1, 1], [], []>} : vector<8x8xf32>, vector<8x256xf32>, vector<8x256xf32> -> vector<8x256xf32>
    %64 = arith.addf %60, %63 : vector<8x256xf32>
    %c255_i32_42 = arith.constant 255 : i32
    %65 = tpu.dynamic_rotate %54 by %c255_i32_42 dim 1 : vector<8x256xf32>, i32 -> vector<8x256xf32>
    %cst_43 = arith.constant 0.000000e+00 : f32
    %66 = vector.broadcast %cst_43 : f32 to vector<8x256xf32>
    %67 = arith.select %11, %65, %66 : vector<8x256xi1>, vector<8x256xf32>
    %c2_44 = arith.constant 2 : index
    %c0_45 = arith.constant 0 : index
    %c0_46 = arith.constant 0 : index
    %68 = vector.load %arg4[%c2_44, %c0_45, %c0_46] : memref<3x8x8xf32, #tpu.memory_space<vmem>>, vector<1x8x8xf32>
    %69 = vector.shape_cast %68 : vector<1x8x8xf32> to vector<8x8xf32>
    %cst_47 = arith.constant dense<0.000000e+00> : vector<8x256xf32>
    %70 = tpu.matmul %69, %67, %cst_47 {dimension_numbers = #tpu.dot_dimension_numbers<[1], [0], [0], [1], [0, 0, 1, 1], [], []>} : vector<8x8xf32>, vector<8x256xf32>, vector<8x256xf32> -> vector<8x256xf32>
    %71 = arith.addf %64, %70 : vector<8x256xf32>
    %c0_48 = arith.constant 0 : index
    %c0_49 = arith.constant 0 : index
    %72 = vector.load %arg5[%c0_48, %c0_49] : memref<8x1xf32, #tpu.memory_space<vmem>>, vector<8x1xf32>
    %c0_50 = arith.constant 0 : index
    %c0_51 = arith.constant 0 : index
    %73 = vector.load %arg6[%c0_50, %c0_51] : memref<8x1xf32, #tpu.memory_space<vmem>>, vector<8x1xf32>
    %cst_52 = arith.constant dense<0.000000e+00> : vector<8xf32>
    %74 = vector.multi_reduction <add>, %71, %cst_52 [1] : vector<8x256xf32> to vector<8xf32>
    %75 = vector.shape_cast %74 : vector<8xf32> to vector<8x1xf32>
    %cst_53 = arith.constant 3.906250e-03 : f32
    %76 = vector.broadcast %cst_53 : f32 to vector<8x1xf32>
    %77 = arith.mulf %75, %76 : vector<8x1xf32>
    %78 = vector.broadcast %77 : vector<8x1xf32> to vector<8x256xf32>
    %79 = arith.subf %71, %78 : vector<8x256xf32>
    %80 = arith.mulf %79, %79 : vector<8x256xf32>
    %cst_54 = arith.constant dense<0.000000e+00> : vector<8xf32>
    %81 = vector.multi_reduction <add>, %80, %cst_54 [1] : vector<8x256xf32> to vector<8xf32>
    %82 = vector.shape_cast %81 : vector<8xf32> to vector<8x1xf32>
    %cst_55 = arith.constant 3.906250e-03 : f32
    %83 = vector.broadcast %cst_55 : f32 to vector<8x1xf32>
    %84 = arith.mulf %82, %83 : vector<8x1xf32>
    %cst_56 = arith.constant 9.99999974E-6 : f32
    %85 = vector.broadcast %cst_56 : f32 to vector<8x1xf32>
    %86 = arith.addf %84, %85 : vector<8x1xf32>
    %87 = math.rsqrt %86 : vector<8x1xf32>
    %88 = arith.mulf %72, %87 : vector<8x1xf32>
    %89 = arith.mulf %77, %88 : vector<8x1xf32>
    %90 = arith.subf %73, %89 : vector<8x1xf32>
    %c0_57 = arith.constant 0 : index
    %c0_58 = arith.constant 0 : index
    %91 = vector.load %arg8[%c0_57, %c0_58] : memref<8x256xf32, #tpu.memory_space<vmem>>, vector<8x256xf32>
    %92 = vector.broadcast %88 : vector<8x1xf32> to vector<8x256xf32>
    %93 = arith.mulf %71, %92 : vector<8x256xf32>
    %94 = vector.broadcast %90 : vector<8x1xf32> to vector<8x256xf32>
    %95 = arith.addf %93, %94 : vector<8x256xf32>
    %96 = arith.addf %91, %95 : vector<8x256xf32>
    %cst_59 = arith.constant 0.000000e+00 : f32
    %97 = vector.broadcast %cst_59 : f32 to vector<8x256xf32>
    %98 = arith.maximumf %96, %97 : vector<8x256xf32>
    %99 = vector.extract_strided_slice %98 {offsets = [0, 0], sizes = [8, 128], strides = [1, 1]} : vector<8x256xf32> to vector<8x128xf32>
    %c0_60 = arith.constant 0 : index
    %c0_61 = arith.constant 0 : index
    %c0_62 = arith.constant 0 : index
    %100 = vector.load %arg7[%c0_60, %c0_61, %c0_62] : memref<2x8x128xf32, #tpu.memory_space<vmem>>, vector<1x8x128xf32>
    %101 = vector.shape_cast %100 : vector<1x8x128xf32> to vector<8x128xf32>
    %102 = vector.shape_cast %99 : vector<8x128xf32> to vector<1x8x128xf32>
    tpu.vector_store %arg7[%c0_60, %c0_61, %c0_62], %102 {strides = array<i32>} : memref<2x8x128xf32, #tpu.memory_space<vmem>>, vector<1x8x128xf32>,
    %103 = vector.extract_strided_slice %98 {offsets = [0, 128], sizes = [8, 128], strides = [1, 1]} : vector<8x256xf32> to vector<8x128xf32>
    %c1_63 = arith.constant 1 : index
    %c0_64 = arith.constant 0 : index
    %c0_65 = arith.constant 0 : index
    %104 = vector.load %arg7[%c1_63, %c0_64, %c0_65] : memref<2x8x128xf32, #tpu.memory_space<vmem>>, vector<1x8x128xf32>
    %105 = vector.shape_cast %104 : vector<1x8x128xf32> to vector<8x128xf32>
    %106 = vector.shape_cast %103 : vector<8x128xf32> to vector<1x8x128xf32>
    tpu.vector_store %arg7[%c1_63, %c0_64, %c0_65], %106 {strides = array<i32>} : memref<2x8x128xf32, #tpu.memory_space<vmem>>, vector<1x8x128xf32>,
    return
  }
}

</mosaic_0001>

<bundles_post_ra>
// kernel: resblock1d_forward.1
= control target key start
LH: loop header
LB: loop body
LE: loop exit
PB: predicated region body
PF: predicated region fallthrough
CT: control target
= control target key end

     0   :  { %12 = vsyncpa [#allocation4], 0  ;;  %s756_s0 = inlined_call_operand.vmem [shape: f32[2,8,128], index: 0, kind: input, shape index: {}]   ;;  %s757_s1 = inlined_call_operand.hbm [shape: f32[3,8,8], index: 1, kind: input, shape index: {}]   ;;  %s758_s2 = inlined_call_operand.vmem [shape: f32[8,1], index: 2, kind: input, shape index: {}]   ;;  %s759_s3 = inlined_call_operand.vmem [shape: f32[8,1], index: 3, kind: input, shape index: {}]   ;;  %s760_s4 = inlined_call_operand.hbm [shape: f32[3,8,8], index: 4, kind: input, shape index: {}]   ;;  %s761_s5 = inlined_call_operand.vmem [shape: f32[8,1], index: 5, kind: input, shape index: {}]   ;;  %s762_s6 = inlined_call_operand.vmem [shape: f32[8,1], index: 6, kind: input, shape index: {}]   ;;  %s763_s7 = inlined_call_operand.hbm [shape: f32[2,8,128], index: 7, kind: output, shape index: {}]  }
   0x1   :  { %13 = vsyncpa [#allocation7], 0 }
   0x2   :  { %14 = vsyncpa [#allocation5], 0  ;;  %s21_s26 = sshll.u32 %s757_s1, 4  ;;  %s603_s27 = smov [#allocation3]   ;;  %s22_s26 = int_to_ptr.hbm [resolvable:$true] %s21_s26 }
   0x3   :  { %s23_s28 = sshll.u32 %s603_s27, 4  ;;  %s38_s8 = sshll.u32 %s760_s4, 4  ;;  %s24_s28 = int_to_ptr.vmem [resolvable:$true] %s23_s28  ;;  %s39_s8 = int_to_ptr.hbm [resolvable:$true] %s38_s8 }
   0x4   :  { %s604_s9 = smov 128   ;;  %s605_s10 = smov 8  }
   0x5   :  { %29 = dma.hbm_to_vmem [thread:$0]  %s22_s26, 384, %s24_s28, [#allocation4], %s604_s9, %s604_s9, %s605_s10  }
   0x6   :  { %s606_s11 = smov [#allocation6]  }
   0x7   :  { %s40_s12 = sshll.u32 %s606_s11, 4  ;;  %s41_s12 = int_to_ptr.vmem [resolvable:$true] %s40_s12 }
   0x8   :  { %46 = dma.hbm_to_vmem [thread:$0]  %s39_s8, 384, %s41_s12, [#allocation7], %s604_s9, %s604_s9, %s605_s10  }
   0x9   :  { %597 = dma.done.wait [#allocation4], 384  }
   0xa   :  { %598 = vsyncadd [#allocation4], 4294966912 }
   0xb   :  { %599 = dma.done.wait [#allocation7], 384  }
   0xc   :  { %600 = vsyncadd [#allocation7], 4294966912  ;;  %v666_v0 = vld [vmem:[%s756_s0] sm:$0xff]  ;;  %s607_s13 = smov 127   ;;  %s608_s14 = smov 1   ;;  %v675_v1 = vld [vmem:[%s756_s0 + $0x8] sm:$0xff]  ;;  %v64_v3 = vlaneseq }
   0xd   :  { %169 = vrot.lane.b32.xlu1 %v666_v0, %s607_s13  ;;  %70 = vrot.lane.b32.xlu0 %v666_v0, %s608_s14  ;;  %v81_v2 = vld [vmem:[#allocation3 + $0x8] sm:$0xff]  ;;  %vm82_vm0 = vcmask 64512   ;;  %v79_v13 = vld [vmem:[#allocation3] sm:$0xff]  ;;  %v178_v14 = vld [vmem:[#allocation3 + $0x10] sm:$0xff]  ;;  %v609_v33 = vmov 0   ;;  %s475_s25 = sshll.u32 %s763_s7, 4  ;;  %s476_s25 = int_to_ptr.hbm [resolvable:$true] %s475_s25 }
   0xe   :  { %101 = vmatpush.msra.mxu0 %v666_v0  ;;  %121 = vmatpush.msra.mxu1 %v675_v1  ;;  %v685_v6 = vand.u32 127, %v64_v3  ;;  %v224_v42 = vld [vmem:[%s758_s2] sm:$0xff]  ;;  %v374_v60 = vld [vmem:[#allocation6 + $0x10] sm:$0xff]  ;;  %v276_v3 = vld [vmem:[#allocation6] sm:$0xff] }
   0xf   :  { %490 = vmatmul.msk.f32.vlgmr.msra.gmra.mxu0 %vm82_vm0, %v81_v2  ;;  %491 = vmatmul.msk.f32.vlgmr.msra.gmra.mxu1 %vm82_vm0, %v81_v2  ;;  %v225_v46 = vld [vmem:[%s759_s3] sm:$0xff] }
  0x10   :  { %vm67_vm1 = vcmp.lt.s32.totalorder %v685_v6, 127  ;;  %vm74_vm2 = vcmp.lt.s32.totalorder %v685_v6, 1  ;;  %vm66_vm3 = vcmp.ge.s32.totalorder %v685_v6, 1  ;;  %518 = vset.pattern.permute.xlu0 %v609_v33  ;;  %519 = vset.pattern.permute.xlu1 %v609_v33  ;;  %v278_v57 = vld [vmem:[#allocation6 + $0x8] sm:$0xff] }
  0x11   :  { %520 = vset.pattern.permute.xlu2 %v609_v33 }
  0x15   :  { %171 = vrot.lane.b32.xlu1 %v675_v1, %s607_s13  ;;  %72 = vrot.lane.b32.xlu0 %v675_v1, %s608_s14 }
  0x7f   :  { %v170_v4 = vpop.permute.xlu1 %169  ;;  %v71_v5 = vpop.permute.xlu0 %70 }
  0x87   :  { %v172_v7 = vpop.permute.xlu1 %171  ;;  %v73_v8 = vpop.permute.xlu0 %72 }
  0x88   :  { %v76_v9 = vsel %vm74_vm2, %v73_v8, %v71_v5  ;;  %v75_v10 = vsel %vm74_vm2, %v71_v5, %v73_v8  ;;  %v173_v11 = vsel %vm67_vm1, %v170_v4, %v172_v7  ;;  %v174_v12 = vsel %vm67_vm1, %v172_v7, %v170_v4 }
  0x89   :  { %492 = vmatpush.msk.msra.mxu2 %vm66_vm3, %v76_v9  ;;  %494 = vmatpush.msk.msra.mxu3 %vm66_vm3, %v75_v10 }
  0x8a   :  { %496 = vmatpush.msk.msrb.mxu0 %vm67_vm1, %v173_v11  ;;  %498 = vmatpush.msk.msrb.mxu1 %vm67_vm1, %v174_v12 }
  0x8b   :  { %493 = vmatmul.msk.f32.vlgmr.msra.gmra.mxu2 %vm82_vm0, %v79_v13  ;;  %495 = vmatmul.msk.f32.vlgmr.msra.gmra.mxu3 %vm82_vm0, %v79_v13 }
  0x8c   :  { %497 = vmatmul.msk.f32.vlgmr.msrb.gmra.mxu0 %vm82_vm0, %v178_v14  ;;  %499 = vmatmul.msk.f32.vlgmr.msrb.gmra.mxu1 %vm82_vm0, %v178_v14  ;;  %v103_v15 = vpop.f32.mrf.mxu0  ;;  %v123_v16 = vpop.f32.mrf.mxu1 }
 0x109   :  { %v199_v17 = vpop.f32.mrf.mxu0  ;;  %v219_v18 = vpop.f32.mrf.mxu1 }
 0x10e   :  { %v146_v19 = vpop.f32.mrf.mxu2  ;;  %v166_v20 = vpop.f32.mrf.mxu3 }
 0x10f   :  { %v147_v21 = vadd.f32 %v146_v19, %v103_v15  ;;  %v167_v22 = vadd.f32 %v166_v20, %v123_v16 }
 0x111   :  { %v222_v23 = vadd.f32 %v199_v17, %v147_v21  ;;  %v223_v24 = vadd.f32 %v219_v18, %v167_v22 }
 0x113   :  { %v226_v25 = vadd.f32 %v223_v24, %v222_v23 }
 0x115   :  { %227 = vadd.xlane.f32.xlu2 %v226_v25 }
 0x188   :  { %v228_v26 = vpop.xlane.xlu2 %227 }
 0x189   :  { %v229_v27 = vmul.f32 0.00390625, %v228_v26 }
 0x18b   :  { %v230_v28 = vsub.f32 %v222_v23, %v229_v27  ;;  %v231_v29 = vsub.f32 %v223_v24, %v229_v27 }
 0x18d   :  { %v232_v30 = vmul.f32 %v230_v28, %v230_v28  ;;  %v233_v31 = vmul.f32 %v231_v29, %v231_v29 }
 0x18f   :  { %v234_v32 = vadd.f32 %v233_v31, %v232_v30 }
 0x191   :  { %235 = vadd.xlane.f32.xlu2 %v234_v32  ;;  %v420_v32 = vld [vmem:[%s761_s5] sm:$0xff]  ;;  %s610_s5 = smov [#allocation8]  }
 0x192   :  { %s473_s22 = sshll.u32 %s610_s5, 4  ;;  %s474_s22 = int_to_ptr.vmem [resolvable:$true] %s473_s22 }
 0x204   :  { %v236_v34 = vpop.xlane.xlu2 %235 }
 0x205   :  { %v237_v35 = vmul.f32 0.00390625, %v236_v34 }
 0x207   :  { %v238_v36 = vadd.f32 1e-05, %v237_v35 }
 0x209   :  { %521 = vrsqrt.f32 %v238_v36  ;;  %vm245_vm5 = vweird.f32 %v238_v36 }
 0x20f   :  { %v522_v37 = vpop.eup %521 }
 0x210   :  { %v240_v38 = vmul.f32 %v522_v37, %v238_v36  ;;  %vm246_vm4 = vweird.f32 %v522_v37 }
 0x211   :  { %vm247_vm6 = vmor %vm245_vm5, %vm246_vm4 }
 0x212   :  { %v241_v39 = vmul.f32 %v522_v37, %v240_v38 }
 0x214   :  { %v242_v40 = vmul.f32 0.5, %v241_v39 }
 0x216   :  { %v243_v41 = vsub.f32 1.5, %v242_v40 }
 0x218   :  { %v244_v43 = vmul.f32 %v522_v37, %v243_v41 }
 0x21a   :  { %v248_v44 = vsel %vm247_vm6, %v522_v37, %v244_v43  ;;  %v421_v37 = vld [vmem:[%s762_s6] sm:$0xff] }
 0x21b   :  { %v249_v45 = vmul.f32 %v248_v44, %v224_v42 }
 0x21d   :  { %254 = vperm.xlu0 %518, %v249_v45   ;;  %v250_v47 = vmul.f32 %v249_v45, %v229_v27 }
 0x21f   :  { %v251_v48 = vsub.f32 %v225_v46, %v250_v47 }
 0x221   :  { %261 = vperm.xlu1 %519, %v251_v48  }
 0x28f   :  { %v255_v49 = vpop.permute.xlu0 %254 }
 0x290   :  { %v257_v50 = vmul.f32 %v255_v49, %v222_v23  ;;  %v258_v51 = vmul.f32 %v255_v49, %v223_v24 }
 0x293   :  { %v262_v52 = vpop.permute.xlu1 %261 }
 0x294   :  { %v264_v53 = vadd.f32 %v262_v52, %v257_v50  ;;  %v265_v54 = vadd.f32 %v262_v52, %v258_v51 }
 0x296   :  { %v266_v55 = vmax.f32 %v264_v53, 0.0  ;;  %v267_v56 = vmax.f32 %v265_v54, 0.0 }
 0x298   :  { %367 = vrot.lane.b32.xlu1 %v267_v56, %s607_s13  ;;  %317 = vmatpush.msrb.mxu3 %v267_v56 }
 0x299   :  { %268 = vrot.lane.b32.xlu0 %v266_v55, %s608_s14  ;;  %365 = vrot.lane.b32.xlu2 %v266_v55, %s607_s13 }
 0x29a   :  { %297 = vmatpush.msrb.mxu2 %v266_v55  ;;  %501 = vmatmul.msk.f32.vlgmr.msrb.gmra.mxu3 %vm82_vm0, %v278_v57 }
 0x29b   :  { %500 = vmatmul.msk.f32.vlgmr.msrb.gmra.mxu2 %vm82_vm0, %v278_v57 }
 0x2a0   :  { %270 = vrot.lane.b32.xlu1 %v267_v56, %s608_s14 }
 0x2f3   :  { %v366_v58 = vpop.permute.xlu2 %365 }
 0x30a   :  { %v368_v59 = vpop.permute.xlu1 %367 }
 0x30b   :  { %v369_v61 = vsel %vm67_vm1, %v366_v58, %v368_v59  ;;  %v370_v62 = vsel %vm67_vm1, %v368_v59, %v366_v58  ;;  %v269_v63 = vpop.permute.xlu0 %268 }
 0x30c   :  { %506 = vmatpush.msk.msra.mxu2 %vm67_vm1, %v369_v61  ;;  %508 = vmatpush.msk.msra.mxu3 %vm67_vm1, %v370_v62 }
 0x30d   :  { %507 = vmatmul.msk.f32.vlgmr.msra.gmra.mxu2 %vm82_vm0, %v374_v60  ;;  %509 = vmatmul.msk.f32.vlgmr.msra.gmra.mxu3 %vm82_vm0, %v374_v60 }
 0x312   :  { %v271_v2 = vpop.permute.xlu1 %270 }
 0x313   :  { %v272_v4 = vsel %vm74_vm2, %v269_v63, %v271_v2  ;;  %v273_v5 = vsel %vm74_vm2, %v271_v2, %v269_v63 }
 0x314   :  { %502 = vmatpush.msk.msra.mxu0 %vm66_vm3, %v273_v5  ;;  %504 = vmatpush.msk.msra.mxu1 %vm66_vm3, %v272_v4 }
 0x315   :  { %503 = vmatmul.msk.f32.vlgmr.msra.gmra.mxu0 %vm82_vm0, %v276_v3  ;;  %505 = vmatmul.msk.f32.vlgmr.msra.gmra.mxu1 %vm82_vm0, %v276_v3 }
 0x31d   :  { %v319_v8 = vpop.f32.mrf.mxu3 }
 0x31e   :  { %v299_v7 = vpop.f32.mrf.mxu2 }
 0x390   :  { %v395_v9 = vpop.f32.mrf.mxu2  ;;  %v415_v10 = vpop.f32.mrf.mxu3 }
 0x392   :  { %v342_v11 = vpop.f32.mrf.mxu0  ;;  %v362_v12 = vpop.f32.mrf.mxu1 }
 0x393   :  { %v343_v13 = vadd.f32 %v342_v11, %v299_v7  ;;  %v363_v14 = vadd.f32 %v362_v12, %v319_v8 }
 0x395   :  { %v418_v15 = vadd.f32 %v395_v9, %v343_v13  ;;  %v419_v16 = vadd.f32 %v415_v10, %v363_v14 }
 0x397   :  { %v422_v17 = vadd.f32 %v419_v16, %v418_v15 }
 0x399   :  { %423 = vadd.xlane.f32.xlu0 %v422_v17 }
 0x40c   :  { %v424_v18 = vpop.xlane.xlu0 %423 }
 0x40d   :  { %v425_v19 = vmul.f32 0.00390625, %v424_v18 }
 0x40f   :  { %v426_v6 = vsub.f32 %v418_v15, %v425_v19  ;;  %v427_v20 = vsub.f32 %v419_v16, %v425_v19 }
 0x411   :  { %v428_v21 = vmul.f32 %v426_v6, %v426_v6  ;;  %v429_v22 = vmul.f32 %v427_v20, %v427_v20 }
 0x413   :  { %v430_v23 = vadd.f32 %v429_v22, %v428_v21 }
 0x415   :  { %431 = vadd.xlane.f32.xlu1 %v430_v23 }
 0x488   :  { %v432_v24 = vpop.xlane.xlu1 %431 }
 0x489   :  { %v433_v25 = vmul.f32 0.00390625, %v432_v24 }
 0x48b   :  { %v434_v26 = vadd.f32 1e-05, %v433_v25 }
 0x48d   :  { %523 = vrsqrt.f32 %v434_v26  ;;  %vm441_vm8 = vweird.f32 %v434_v26 }
 0x493   :  { %v524_v27 = vpop.eup %523 }
 0x494   :  { %v436_v28 = vmul.f32 %v524_v27, %v434_v26  ;;  %vm442_vm7 = vweird.f32 %v524_v27 }
 0x495   :  { %vm443_vm9 = vmor %vm441_vm8, %vm442_vm7 }
 0x496   :  { %v437_v29 = vmul.f32 %v524_v27, %v436_v28 }
 0x498   :  { %v438_v30 = vmul.f32 0.5, %v437_v29 }
 0x49a   :  { %v439_v31 = vsub.f32 1.5, %v438_v30 }
 0x49c   :  { %v440_v33 = vmul.f32 %v524_v27, %v439_v31 }
 0x49e   :  { %v444_v34 = vsel %vm443_vm9, %v524_v27, %v440_v33 }
 0x49f   :  { %v445_v35 = vmul.f32 %v444_v34, %v420_v32 }
 0x4a1   :  { %450 = vperm.xlu2 %520, %v445_v35   ;;  %v446_v36 = vmul.f32 %v445_v35, %v425_v19 }
 0x4a3   :  { %v447_v38 = vsub.f32 %v421_v37, %v446_v36 }
 0x4a9   :  { %457 = vperm.xlu2 %520, %v447_v38  }
 0x4fb   :  { %v451_v39 = vpop.permute.xlu2 %450 }
 0x4fc   :  { %v453_v40 = vmul.f32 %v451_v39, %v418_v15  ;;  %v454_v41 = vmul.f32 %v451_v39, %v419_v16 }
 0x503   :  { %v458_v42 = vpop.permute.xlu2 %457 }
 0x504   :  { %v460_v43 = vadd.f32 %v458_v42, %v453_v40  ;;  %v461_v44 = vadd.f32 %v458_v42, %v454_v41 }
 0x506   :  { %v462_v45 = vadd.f32 %v460_v43, %v666_v0  ;;  %v463_v46 = vadd.f32 %v675_v1, %v461_v44 }
 0x508   :  { %v464_v47 = vmax.f32 %v462_v45, 0.0  ;;  %v465_v48 = vmax.f32 %v463_v46, 0.0 }
 0x50a   :  { %466 = vst [vmem:[#allocation8] sm:$0xff] %v464_v47 }
 0x50b   :  { %468 = vst [vmem:[#allocation8 + $0x8] sm:$0xff] %v465_v48 }
 0x50c   :  { %481 = dma.vmem_to_hbm [thread:$0]  %s474_s22, 256, %s476_s25, [#allocation5], %s604_s9, %s604_s9, %s605_s10  }
 0x50d   :  { %601 = dma.done.wait [#allocation5], 256  }
 0x50e   :  { %602 = vsyncadd [#allocation5], 4294967040 }
 0x50f   :  { %486 = vsyncpa [#allocation4], 1 }
 0x510   :  { %487 = vsyncpa [#allocation7], 1 }
 0x511   :  { %488 = vsyncpa [#allocation5], 1 }

</bundles_post_ra>
